<compile_context>
chip_gen: v7x
topology: tpu7x:2x2x1
jax: 0.10.0
libtpu: 0.0.40
codegen_flags: <defaults>
</compile_context>

<pallas_src>
import functools

import jax
import jax.numpy as jnp
from jax.experimental import pallas as pl
from jax.experimental.pallas import tpu as pltpu


# ----------------------------------------------------------------------------
# helpers
# ----------------------------------------------------------------------------
def _round_up(x, m):
    return ((x + m - 1) // m) * m


def _pick_row_tile(M, target=256, align=16):
    """Row tile: <= target, divides M, `align`-multiple, and (when possible)
    gives at least 2 grid steps so both v7x TensorCores get work."""
    if M <= align:
        return M
    cap = min(target, (M // 2 // align) * align)
    t = max(cap, align)
    while M % t != 0 and t > align:
        t -= align
    return t if M % t == 0 else M


def _layernorm_f32(x, g_ref, b_ref, eps=1e-5):
    """One-pass LayerNorm in f32.  x: (rows, D) f32."""
    mean = jnp.mean(x, axis=-1, keepdims=True)
    msq = jnp.mean(x * x, axis=-1, keepdims=True)
    var = msq - mean * mean
    xn = (x - mean) * jax.lax.rsqrt(var + eps)
    return xn * g_ref[...].astype(jnp.float32) + b_ref[...].astype(jnp.float32)


# ----------------------------------------------------------------------------
# fused attention sublayer kernel (one batch element per grid step):
#   y = x + out_proj( causal_mha( ln_1(x) @ W_qkv + b_qkv ) ) + b_out
# All intermediates (QKV slab, per-head scores, merged heads) stay in VMEM.
# ----------------------------------------------------------------------------
def _attn_block_kernel(x_ref, g1_ref, b1_ref, wqkv_ref, bqkv_ref,
                       wout_ref, bout_ref, o_ref, *, heads, scale):
    x = x_ref[0].astype(jnp.float32)                       # (Lp, D)
    Lp, D = x.shape
    Dh = D // heads

    xn = _layernorm_f32(x, g1_ref, b1_ref)
    qkv = jnp.dot(xn.astype(wqkv_ref.dtype), wqkv_ref[...],
                  preferred_element_type=jnp.float32)
    qkv = qkv + bqkv_ref[...].astype(jnp.float32)          # (Lp, 3D) f32

    row = jax.lax.broadcasted_iota(jnp.int32, (Lp, Lp), 0)
    col = jax.lax.broadcasted_iota(jnp.int32, (Lp, Lp), 1)
    causal = col <= row                                    # lower-triangular

    # TODO(synk): for multi-head configs (Dh=64 < 128 lanes) the static head
    # slices below imply in-VMEM lane relayouts; they never touch HBM though,
    # and fusing out_proj here (review item 2) outweighs grid-per-head split.
    outs = []
    for h in range(heads):
        q = (qkv[:, h * Dh:(h + 1) * Dh] * scale).astype(jnp.bfloat16)
        k = qkv[:, D + h * Dh:D + (h + 1) * Dh].astype(jnp.bfloat16)
        v = qkv[:, 2 * D + h * Dh:2 * D + (h + 1) * Dh].astype(jnp.bfloat16)
        # contract last dims of q and k -> (Lp, Lp); no explicit transpose.
        s = jax.lax.dot_general(q, k, (((1,), (1,)), ((), ())),
                                preferred_element_type=jnp.float32)
        s = jnp.where(causal, s, -1e30)
        m = jnp.max(s, axis=-1, keepdims=True)
        p = jnp.exp(s - m)
        denom = jnp.sum(p, axis=-1, keepdims=True)
        p = p * pl.reciprocal(denom, approx=True)
        o = jnp.dot(p.astype(jnp.bfloat16), v,
                    preferred_element_type=jnp.float32)    # (Lp, Dh) f32
        outs.append(o)

    merged = outs[0] if heads == 1 else jnp.concatenate(outs, axis=-1)
    y = jnp.dot(merged.astype(wout_ref.dtype), wout_ref[...],
                preferred_element_type=jnp.float32)
    y = y + bout_ref[...].astype(jnp.float32) + x          # fused bias + residual
    o_ref[0] = y.astype(o_ref.dtype)


def pallas_attention_block(x, blk, heads):
    B, Lp, D = x.shape
    Dh = D // heads
    kernel = functools.partial(_attn_block_kernel, heads=heads, scale=Dh ** -0.5)
    return pl.pallas_call(
        kernel,
        out_shape=jax.ShapeDtypeStruct((B, Lp, D), x.dtype),
        grid=(B,),
        in_specs=[
            pl.BlockSpec((1, Lp, D), lambda b: (b, 0, 0)),
            pl.BlockSpec((1, D), lambda b: (0, 0)),
            pl.BlockSpec((1, D), lambda b: (0, 0)),
            pl.BlockSpec((D, 3 * D), lambda b: (0, 0)),
            pl.BlockSpec((1, 3 * D), lambda b: (0, 0)),
            pl.BlockSpec((D, D), lambda b: (0, 0)),
            pl.BlockSpec((1, D), lambda b: (0, 0)),
        ],
        out_specs=pl.BlockSpec((1, Lp, D), lambda b: (b, 0, 0)),
        compiler_params=pltpu.CompilerParams(dimension_semantics=("parallel",)),
    )(x, blk["ln1_g"].reshape(1, D), blk["ln1_b"].reshape(1, D),
      blk["w_qkv"], blk["b_qkv"].reshape(1, 3 * D),
      blk["w_out"], blk["b_out"].reshape(1, D))


# ----------------------------------------------------------------------------
# fused MLP sublayer kernel (row-tile per grid step):
#   y = x + ( QuickGELU( ln_2(x) @ W_fc + b_fc ) @ W_proj + b_proj )
# The (tm, 4D) hidden activation never leaves VMEM.
# ----------------------------------------------------------------------------
def _mlp_block_kernel(x_ref, g2_ref, b2_ref, wfc_ref, bfc_ref,
                      wproj_ref, bproj_ref, o_ref):
    x = x_ref[...].astype(jnp.float32)                     # (tm, D)
    xn = _layernorm_f32(x, g2_ref, b2_ref)
    h = jnp.dot(xn.astype(wfc_ref.dtype), wfc_ref[...],
                preferred_element_type=jnp.float32)
    h = h + bfc_ref[...].astype(jnp.float32)
    h = h * jax.nn.sigmoid(1.702 * h)                      # CLIP QuickGELU
    y = jnp.dot(h.astype(wproj_ref.dtype), wproj_ref[...],
                preferred_element_type=jnp.float32)
    y = y + bproj_ref[...].astype(jnp.float32) + x         # fused bias + residual
    o_ref[...] = y.astype(o_ref.dtype)


def pallas_mlp_block(xf, blk):
    M, D = xf.shape
    H = blk["w_fc"].shape[1]
    tm = _pick_row_tile(M)
    return pl.pallas_call(
        _mlp_block_kernel,
        out_shape=jax.ShapeDtypeStruct((M, D), xf.dtype),
        grid=(M // tm,),
        in_specs=[
            pl.BlockSpec((tm, D), lambda i: (i, 0)),
            pl.BlockSpec((1, D), lambda i: (0, 0)),
            pl.BlockSpec((1, D), lambda i: (0, 0)),
            pl.BlockSpec((D, H), lambda i: (0, 0)),
            pl.BlockSpec((1, H), lambda i: (0, 0)),
            pl.BlockSpec((H, D), lambda i: (0, 0)),
            pl.BlockSpec((1, D), lambda i: (0, 0)),
        ],
        out_specs=pl.BlockSpec((tm, D), lambda i: (i, 0)),
        compiler_params=pltpu.CompilerParams(dimension_semantics=("parallel",)),
    )(xf, blk["ln2_g"].reshape(1, D), blk["ln2_b"].reshape(1, D),
      blk["w_fc"], blk["b_fc"].reshape(1, H),
      blk["w_proj"], blk["b_proj"].reshape(1, D))


# ----------------------------------------------------------------------------
# final fused ln_final + text_projection on the B pooled (EOT) rows only
# ----------------------------------------------------------------------------
def _pool_proj_kernel(x_ref, g_ref, b_ref, w_ref, o_ref):
    x = x_ref[...].astype(jnp.float32)
    xn = _layernorm_f32(x, g_ref, b_ref)
    y = jnp.dot(xn.astype(w_ref.dtype), w_ref[...],
                preferred_element_type=jnp.float32)
    o_ref[...] = y.astype(o_ref.dtype)


def pallas_pool_proj(pooled, gamma, beta, w_proj, out_dtype=jnp.float32):
    Bp, D = pooled.shape
    E = w_proj.shape[1]
    return pl.pallas_call(
        _pool_proj_kernel,
        out_shape=jax.ShapeDtypeStruct((Bp, E), out_dtype),
        grid=(1,),
        in_specs=[
            pl.BlockSpec((Bp, D), lambda i: (0, 0)),
            pl.BlockSpec((1, D), lambda i: (0, 0)),
            pl.BlockSpec((1, D), lambda i: (0, 0)),
            pl.BlockSpec((D, E), lambda i: (0, 0)),
        ],
        out_specs=pl.BlockSpec((Bp, E), lambda i: (0, 0)),
    )(pooled, gamma.reshape(1, D), beta.reshape(1, D), w_proj)


# ----------------------------------------------------------------------------
# Parameter init (synthetic, deterministic) and forward pass
# ----------------------------------------------------------------------------
def init_params(key, vocab_size, context_length, width, layers, embed_dim):
    keys = jax.random.split(key, 3 + layers)
    wdt = jnp.bfloat16
    params = {
        "token_embedding": (jax.random.normal(keys[0], (vocab_size, width), jnp.float32) * 0.02).astype(wdt),
        "positional_embedding": (jax.random.normal(keys[1], (context_length, width), jnp.float32) * 0.01).astype(wdt),
        "ln_final_g": jnp.ones((width,), jnp.float32),
        "ln_final_b": jnp.zeros((width,), jnp.float32),
        "text_projection": (jax.random.normal(keys[2], (width, embed_dim), jnp.float32) * (width ** -0.5)).astype(wdt),
        "blocks": [],
    }
    for l in range(layers):
        k = jax.random.split(keys[3 + l], 4)
        params["blocks"].append({
            "ln1_g": jnp.ones((width,), jnp.float32), "ln1_b": jnp.zeros((width,), jnp.float32),
            "ln2_g": jnp.ones((width,), jnp.float32), "ln2_b": jnp.zeros((width,), jnp.float32),
            "w_qkv": (jax.random.normal(k[0], (width, 3 * width), jnp.float32) * (width ** -0.5)).astype(wdt),
            "b_qkv": jnp.zeros((3 * width,), jnp.float32),
            "w_out": (jax.random.normal(k[1], (width, width), jnp.float32) * (width ** -0.5)).astype(wdt),
            "b_out": jnp.zeros((width,), jnp.float32),
            "w_fc": (jax.random.normal(k[2], (width, 4 * width), jnp.float32) * (width ** -0.5)).astype(wdt),
            "b_fc": jnp.zeros((4 * width,), jnp.float32),
            "w_proj": (jax.random.normal(k[3], (4 * width, width), jnp.float32) * ((4 * width) ** -0.5)).astype(wdt),
            "b_proj": jnp.zeros((width,), jnp.float32),
        })
    return params


def text_encoder_forward(params, text, heads):
    """CLIP encode_text semantics. text: int32 [B, L] token ids."""
    B, L = text.shape
    D = params["token_embedding"].shape[1]
    # bf16 packs 16 sublanes/vreg; for real CLIP (L=77) pad to 128 so the
    # (Lp, Lp) score matrix is lane-dense.
    Lp = _round_up(L, 16) if L <= 64 else _round_up(L, 128)

    # token embedding gather + positional embedding (glue: plain JAX)
    x = jnp.take(params["token_embedding"], text, axis=0)             # [B, L, D]
    x = x + params["positional_embedding"][None, :L, :]
    if Lp != L:
        # Padded positions come after every real position, so the causal mask
        # guarantees real queries never attend to them; padded rows are never
        # pooled.
        x = jnp.pad(x, ((0, 0), (0, Lp - L), (0, 0)))
    x = x.astype(jnp.bfloat16)
    # TODO(synk): emb_dropout=0.0 in the reference config, so dropout is a no-op.

    for blk in params["blocks"]:
        x = pallas_attention_block(x, blk, heads)          # [B, Lp, D]
        xf = pallas_mlp_block(x.reshape(B * Lp, D), blk)   # [B*Lp, D]
        x = xf.reshape(B, Lp, D)

    # Pool at the EOT token (argmax over token ids, matching CLIP), then apply
    # ln_final + text_projection to just the B pooled rows (row-wise LN ->
    # identical math to LN-before-pool).
    eot_idx = jnp.argmax(text, axis=-1)                                # [B]
    pooled = x[jnp.arange(B), eot_idx]                                 # [B, D]
    out = pallas_pool_proj(pooled, params["ln_final_g"], params["ln_final_b"],
                           params["text_projection"])                  # [B, E] f32
    return out


if __name__ == "__main__":
    # small config consistent with the module: transformer_width=64 -> heads=1
    B = 2
    CONTEXT_LENGTH = 8
    VOCAB_SIZE = 64
    WIDTH = 64
    HEADS = max(1, WIDTH // 64)
    LAYERS = 2
    EMBED_DIM = 32

    key = jax.random.PRNGKey(0)
    pkey, tkey = jax.random.split(key)
    params = init_params(pkey, VOCAB_SIZE, CONTEXT_LENGTH, WIDTH, LAYERS, EMBED_DIM)

    # synthetic tokenized text: [B, context_length] int32 ids
    text = jax.random.randint(tkey, (B, CONTEXT_LENGTH), 0, VOCAB_SIZE, dtype=jnp.int32)

    fwd = jax.jit(functools.partial(text_encoder_forward, heads=HEADS))
    out = fwd(params, text)
    out = jax.block_until_ready(out)
    assert out.shape == (B, EMBED_DIM), out.shape
    print("KERNEL_OK")
</pallas_src>

<mosaic_0001>
module attributes {stable_mosaic.version = 11 : i64} {
  func.func @_mlp_block_kernel(%arg0: i32, %arg1: memref<16x64xbf16, #tpu.memory_space<vmem>>, %arg2: memref<1x64xf32, #tpu.memory_space<vmem>>, %arg3: memref<1x64xf32, #tpu.memory_space<vmem>>, %arg4: memref<64x256xbf16, #tpu.memory_space<vmem>>, %arg5: memref<1x256xf32, #tpu.memory_space<vmem>>, %arg6: memref<256x64xbf16, #tpu.memory_space<vmem>>, %arg7: memref<1x64xf32, #tpu.memory_space<vmem>>, %arg8: memref<16x64xbf16, #tpu.memory_space<vmem>>) attributes {dimension_semantics = [#tpu.dimension_semantics<parallel>], iteration_bounds = array<i64: 2>, scalar_prefetch = 0 : i64, scratch_operands = 0 : i64, tpu.core_type = #tpu.core_type<tc>, window_params = [{transform_indices = @transform_0, window_bounds = array<i64: 16, 64>}, {pipeline_mode = #tpu.pipeline_mode<synchronous>, transform_indices = @transform_1, window_bounds = array<i64: 1, 64>}, {pipeline_mode = #tpu.pipeline_mode<synchronous>, transform_indices = @transform_2, window_bounds = array<i64: 1, 64>}, {pipeline_mode = #tpu.pipeline_mode<synchronous>, transform_indices = @transform_3, window_bounds = array<i64: 64, 256>}, {pipeline_mode = #tpu.pipeline_mode<synchronous>, transform_indices = @transform_4, window_bounds = array<i64: 1, 256>}, {pipeline_mode = #tpu.pipeline_mode<synchronous>, transform_indices = @transform_5, window_bounds = array<i64: 256, 64>}, {pipeline_mode = #tpu.pipeline_mode<synchronous>, transform_indices = @transform_6, window_bounds = array<i64: 1, 64>}, {transform_indices = @transform_7, window_bounds = array<i64: 16, 64>}]} {
    %c0 = arith.constant 0 : index
    %c0_0 = arith.constant 0 : index
    %0 = vector.load %arg1[%c0, %c0_0] : memref<16x64xbf16, #tpu.memory_space<vmem>>, vector<16x64xbf16>
    %1 = arith.extf %0 : vector<16x64xbf16> to vector<16x64xf32>
    %cst = arith.constant dense<0.000000e+00> : vector<16xf32>
    %2 = vector.multi_reduction <add>, %1, %cst [1] : vector<16x64xf32> to vector<16xf32>
    %3 = vector.shape_cast %2 : vector<16xf32> to vector<16x1xf32>
    %cst_1 = arith.constant 6.400000e+01 : f32
    %4 = vector.broadcast %cst_1 : f32 to vector<16x1xf32>
    %5 = arith.divf %3, %4 : vector<16x1xf32>
    %6 = arith.mulf %1, %1 : vector<16x64xf32>
    %cst_2 = arith.constant dense<0.000000e+00> : vector<16xf32>
    %7 = vector.multi_reduction <add>, %6, %cst_2 [1] : vector<16x64xf32> to vector<16xf32>
    %8 = vector.shape_cast %7 : vector<16xf32> to vector<16x1xf32>
    %cst_3 = arith.constant 6.400000e+01 : f32
    %9 = vector.broadcast %cst_3 : f32 to vector<16x1xf32>
    %10 = arith.divf %8, %9 : vector<16x1xf32>
    %11 = arith.mulf %5, %5 : vector<16x1xf32>
    %12 = arith.subf %10, %11 : vector<16x1xf32>
    %13 = vector.broadcast %5 : vector<16x1xf32> to vector<16x64xf32>
    %14 = arith.subf %1, %13 : vector<16x64xf32>
    %cst_4 = arith.constant 9.99999974E-6 : f32
    %15 = vector.broadcast %cst_4 : f32 to vector<16x1xf32>
    %16 = arith.addf %12, %15 : vector<16x1xf32>
    %17 = math.rsqrt %16 : vector<16x1xf32>
    %18 = vector.broadcast %17 : vector<16x1xf32> to vector<16x64xf32>
    %19 = arith.mulf %14, %18 : vector<16x64xf32>
    %c0_5 = arith.constant 0 : index
    %c0_6 = arith.constant 0 : index
    %20 = vector.load %arg2[%c0_5, %c0_6] : memref<1x64xf32, #tpu.memory_space<vmem>>, vector<1x64xf32>
    %21 = vector.broadcast %20 : vector<1x64xf32> to vector<16x64xf32>
    %22 = arith.mulf %19, %21 : vector<16x64xf32>
    %c0_7 = arith.constant 0 : index
    %c0_8 = arith.constant 0 : index
    %23 = vector.load %arg3[%c0_7, %c0_8] : memref<1x64xf32, #tpu.memory_space<vmem>>, vector<1x64xf32>
    %24 = vector.broadcast %23 : vector<1x64xf32> to vector<16x64xf32>
    %25 = arith.addf %22, %24 : vector<16x64xf32>
    %26 = arith.truncf %25 : vector<16x64xf32> to vector<16x64xbf16>
    %c0_9 = arith.constant 0 : index
    %c0_10 = arith.constant 0 : index
    %27 = vector.load %arg4[%c0_9, %c0_10] : memref<64x256xbf16, #tpu.memory_space<vmem>>, vector<64x256xbf16>
    %cst_11 = arith.constant dense<0.000000e+00> : vector<16x256xf32>
    %28 = tpu.matmul %26, %27, %cst_11 {dimension_numbers = #tpu.dot_dimension_numbers<[1], [0], [0], [1], [0, 0, 1, 1], [], []>} : vector<16x64xbf16>, vector<64x256xbf16>, vector<16x256xf32> -> vector<16x256xf32>
    %c0_12 = arith.constant 0 : index
    %c0_13 = arith.constant 0 : index
    %29 = vector.load %arg5[%c0_12, %c0_13] : memref<1x256xf32, #tpu.memory_space<vmem>>, vector<1x256xf32>
    %30 = vector.broadcast %29 : vector<1x256xf32> to vector<16x256xf32>
    %31 = arith.addf %28, %30 : vector<16x256xf32>
    %cst_14 = arith.constant 1.702000e+00 : f32
    %32 = vector.broadcast %cst_14 : f32 to vector<16x256xf32>
    %33 = arith.mulf %32, %31 : vector<16x256xf32>
    %34 = arith.negf %33 : vector<16x256xf32>
    %35 = math.exp %34 : vector<16x256xf32>
    %cst_15 = arith.constant 1.000000e+00 : f32
    %36 = vector.broadcast %cst_15 : f32 to vector<16x256xf32>
    %37 = arith.addf %36, %35 : vector<16x256xf32>
    %38 = arith.divf %36, %37 : vector<16x256xf32>
    %39 = arith.mulf %31, %38 : vector<16x256xf32>
    %40 = arith.truncf %39 : vector<16x256xf32> to vector<16x256xbf16>
    %c0_16 = arith.constant 0 : index
    %c0_17 = arith.constant 0 : index
    %41 = vector.load %arg6[%c0_16, %c0_17] : memref<256x64xbf16, #tpu.memory_space<vmem>>, vector<256x64xbf16>
    %cst_18 = arith.constant dense<0.000000e+00> : vector<16x64xf32>
    %42 = tpu.matmul %40, %41, %cst_18 {dimension_numbers = #tpu.dot_dimension_numbers<[1], [0], [0], [1], [0, 0, 1, 1], [], []>} : vector<16x256xbf16>, vector<256x64xbf16>, vector<16x64xf32> -> vector<16x64xf32>
    %c0_19 = arith.constant 0 : index
    %c0_20 = arith.constant 0 : index
    %43 = vector.load %arg7[%c0_19, %c0_20] : memref<1x64xf32, #tpu.memory_space<vmem>>, vector<1x64xf32>
    %44 = vector.broadcast %43 : vector<1x64xf32> to vector<16x64xf32>
    %45 = arith.addf %42, %44 : vector<16x64xf32>
    %46 = arith.addf %45, %1 : vector<16x64xf32>
    %47 = arith.truncf %46 : vector<16x64xf32> to vector<16x64xbf16>
    %c0_21 = arith.constant 0 : index
    %c0_22 = arith.constant 0 : index
    %48 = vector.load %arg8[%c0_21, %c0_22] : memref<16x64xbf16, #tpu.memory_space<vmem>>, vector<16x64xbf16>
    tpu.vector_store %arg8[%c0_21, %c0_22], %47 {strides = array<i32>} : memref<16x64xbf16, #tpu.memory_space<vmem>>, vector<16x64xbf16>,
    return
  }
  func.func @transform_0(%arg0: i32) -> (i32, i32) {
    %c0_i32 = arith.constant 0 : i32
    %c0_i32_0 = arith.constant 0 : i32
    return %arg0, %c0_i32 : i32, i32
  }
  func.func @transform_1(%arg0: i32) -> (i32, i32) {
    %c0_i32 = arith.constant 0 : i32
    %c0_i32_0 = arith.constant 0 : i32
    %c0_i32_1 = arith.constant 0 : i32
    return %c0_i32, %c0_i32_0 : i32, i32
  }
  func.func @transform_2(%arg0: i32) -> (i32, i32) {
    %c0_i32 = arith.constant 0 : i32
    %c0_i32_0 = arith.constant 0 : i32
    %c0_i32_1 = arith.constant 0 : i32
    return %c0_i32, %c0_i32_0 : i32, i32
  }
  func.func @transform_3(%arg0: i32) -> (i32, i32) {
    %c0_i32 = arith.constant 0 : i32
    %c0_i32_0 = arith.constant 0 : i32
    %c0_i32_1 = arith.constant 0 : i32
    return %c0_i32, %c0_i32_0 : i32, i32
  }
  func.func @transform_4(%arg0: i32) -> (i32, i32) {
    %c0_i32 = arith.constant 0 : i32
    %c0_i32_0 = arith.constant 0 : i32
    %c0_i32_1 = arith.constant 0 : i32
    return %c0_i32, %c0_i32_0 : i32, i32
  }
  func.func @transform_5(%arg0: i32) -> (i32, i32) {
    %c0_i32 = arith.constant 0 : i32
    %c0_i32_0 = arith.constant 0 : i32
    %c0_i32_1 = arith.constant 0 : i32
    return %c0_i32, %c0_i32_0 : i32, i32
  }
  func.func @transform_6(%arg0: i32) -> (i32, i32) {
    %c0_i32 = arith.constant 0 : i32
    %c0_i32_0 = arith.constant 0 : i32
    %c0_i32_1 = arith.constant 0 : i32
    return %c0_i32, %c0_i32_0 : i32, i32
  }
  func.func @transform_7(%arg0: i32) -> (i32, i32) {
    %c0_i32 = arith.constant 0 : i32
    %c0_i32_0 = arith.constant 0 : i32
    return %arg0, %c0_i32 : i32, i32
  }
}

module attributes {stable_mosaic.version = 11 : i64} {
  func.func @_pool_proj_kernel(%arg0: i32, %arg1: memref<2x64xbf16, #tpu.memory_space<vmem>>, %arg2: memref<1x64xf32, #tpu.memory_space<vmem>>, %arg3: memref<1x64xf32, #tpu.memory_space<vmem>>, %arg4: memref<64x32xbf16, #tpu.memory_space<vmem>>, %arg5: memref<2x32xf32, #tpu.memory_space<vmem>>) attributes {dimension_semantics = [#tpu.dimension_semantics<arbitrary>], iteration_bounds = array<i64: 1>, scalar_prefetch = 0 : i64, scratch_operands = 0 : i64, tpu.core_type = #tpu.core_type<tc>, window_params = [{pipeline_mode = #tpu.pipeline_mode<synchronous>, transform_indices = @transform_0, window_bounds = array<i64: 2, 64>}, {pipeline_mode = #tpu.pipeline_mode<synchronous>, transform_indices = @transform_1, window_bounds = array<i64: 1, 64>}, {pipeline_mode = #tpu.pipeline_mode<synchronous>, transform_indices = @transform_2, window_bounds = array<i64: 1, 64>}, {pipeline_mode = #tpu.pipeline_mode<synchronous>, transform_indices = @transform_3, window_bounds = array<i64: 64, 32>}, {pipeline_mode = #tpu.pipeline_mode<synchronous>, transform_indices = @transform_4, window_bounds = array<i64: 2, 32>}]} {
    %c0 = arith.constant 0 : index
    %c0_0 = arith.constant 0 : index
    %0 = vector.load %arg1[%c0, %c0_0] : memref<2x64xbf16, #tpu.memory_space<vmem>>, vector<2x64xbf16>
    %1 = arith.extf %0 : vector<2x64xbf16> to vector<2x64xf32>
    %cst = arith.constant dense<0.000000e+00> : vector<2xf32>
    %2 = vector.multi_reduction <add>, %1, %cst [1] : vector<2x64xf32> to vector<2xf32>
    %3 = vector.shape_cast %2 : vector<2xf32> to vector<2x1xf32>
    %cst_1 = arith.constant 6.400000e+01 : f32
    %4 = vector.broadcast %cst_1 : f32 to vector<2x1xf32>
    %5 = arith.divf %3, %4 : vector<2x1xf32>
    %6 = arith.mulf %1, %1 : vector<2x64xf32>
    %cst_2 = arith.constant dense<0.000000e+00> : vector<2xf32>
    %7 = vector.multi_reduction <add>, %6, %cst_2 [1] : vector<2x64xf32> to vector<2xf32>
    %8 = vector.shape_cast %7 : vector<2xf32> to vector<2x1xf32>
    %cst_3 = arith.constant 6.400000e+01 : f32
    %9 = vector.broadcast %cst_3 : f32 to vector<2x1xf32>
    %10 = arith.divf %8, %9 : vector<2x1xf32>
    %11 = arith.mulf %5, %5 : vector<2x1xf32>
    %12 = arith.subf %10, %11 : vector<2x1xf32>
    %13 = vector.broadcast %5 : vector<2x1xf32> to vector<2x64xf32>
    %14 = arith.subf %1, %13 : vector<2x64xf32>
    %cst_4 = arith.constant 9.99999974E-6 : f32
    %15 = vector.broadcast %cst_4 : f32 to vector<2x1xf32>
    %16 = arith.addf %12, %15 : vector<2x1xf32>
    %17 = math.rsqrt %16 : vector<2x1xf32>
    %18 = vector.broadcast %17 : vector<2x1xf32> to vector<2x64xf32>
    %19 = arith.mulf %14, %18 : vector<2x64xf32>
    %c0_5 = arith.constant 0 : index
    %c0_6 = arith.constant 0 : index
    %20 = vector.load %arg2[%c0_5, %c0_6] : memref<1x64xf32, #tpu.memory_space<vmem>>, vector<1x64xf32>
    %21 = vector.broadcast %20 : vector<1x64xf32> to vector<2x64xf32>
    %22 = arith.mulf %19, %21 : vector<2x64xf32>
    %c0_7 = arith.constant 0 : index
    %c0_8 = arith.constant 0 : index
    %23 = vector.load %arg3[%c0_7, %c0_8] : memref<1x64xf32, #tpu.memory_space<vmem>>, vector<1x64xf32>
    %24 = vector.broadcast %23 : vector<1x64xf32> to vector<2x64xf32>
    %25 = arith.addf %22, %24 : vector<2x64xf32>
    %26 = arith.truncf %25 : vector<2x64xf32> to vector<2x64xbf16>
    %c0_9 = arith.constant 0 : index
    %c0_10 = arith.constant 0 : index
    %27 = vector.load %arg4[%c0_9, %c0_10] : memref<64x32xbf16, #tpu.memory_space<vmem>>, vector<64x32xbf16>
    %cst_11 = arith.constant dense<0.000000e+00> : vector<2x32xf32>
    %28 = tpu.matmul %26, %27, %cst_11 {dimension_numbers = #tpu.dot_dimension_numbers<[1], [0], [0], [1], [0, 0, 1, 1], [], []>} : vector<2x64xbf16>, vector<64x32xbf16>, vector<2x32xf32> -> vector<2x32xf32>
    %c0_12 = arith.constant 0 : index
    %c0_13 = arith.constant 0 : index
    %29 = vector.load %arg5[%c0_12, %c0_13] : memref<2x32xf32, #tpu.memory_space<vmem>>, vector<2x32xf32>
    tpu.vector_store %arg5[%c0_12, %c0_13], %28 {strides = array<i32>} : memref<2x32xf32, #tpu.memory_space<vmem>>, vector<2x32xf32>,
    return
  }
  func.func @transform_0(%arg0: i32) -> (i32, i32) {
    %c0_i32 = arith.constant 0 : i32
    %c0_i32_0 = arith.constant 0 : i32
    %c0_i32_1 = arith.constant 0 : i32
    return %c0_i32, %c0_i32_0 : i32, i32
  }
  func.func @transform_1(%arg0: i32) -> (i32, i32) {
    %c0_i32 = arith.constant 0 : i32
    %c0_i32_0 = arith.constant 0 : i32
    %c0_i32_1 = arith.constant 0 : i32
    return %c0_i32, %c0_i32_0 : i32, i32
  }
  func.func @transform_2(%arg0: i32) -> (i32, i32) {
    %c0_i32 = arith.constant 0 : i32
    %c0_i32_0 = arith.constant 0 : i32
    %c0_i32_1 = arith.constant 0 : i32
    return %c0_i32, %c0_i32_0 : i32, i32
  }
  func.func @transform_3(%arg0: i32) -> (i32, i32) {
    %c0_i32 = arith.constant 0 : i32
    %c0_i32_0 = arith.constant 0 : i32
    %c0_i32_1 = arith.constant 0 : i32
    return %c0_i32, %c0_i32_0 : i32, i32
  }
  func.func @transform_4(%arg0: i32) -> (i32, i32) {
    %c0_i32 = arith.constant 0 : i32
    %c0_i32_0 = arith.constant 0 : i32
    %c0_i32_1 = arith.constant 0 : i32
    return %c0_i32, %c0_i32_0 : i32, i32
  }
}

module attributes {stable_mosaic.version = 11 : i64} {
  func.func @_attn_block_kernel(%arg0: i32, %arg1: memref<1x16x64xbf16, #tpu.memory_space<vmem>>, %arg2: memref<1x64xf32, #tpu.memory_space<vmem>>, %arg3: memref<1x64xf32, #tpu.memory_space<vmem>>, %arg4: memref<64x192xbf16, #tpu.memory_space<vmem>>, %arg5: memref<1x192xf32, #tpu.memory_space<vmem>>, %arg6: memref<64x64xbf16, #tpu.memory_space<vmem>>, %arg7: memref<1x64xf32, #tpu.memory_space<vmem>>, %arg8: memref<1x16x64xbf16, #tpu.memory_space<vmem>>) attributes {dimension_semantics = [#tpu.dimension_semantics<parallel>], iteration_bounds = array<i64: 2>, scalar_prefetch = 0 : i64, scratch_operands = 0 : i64, tpu.core_type = #tpu.core_type<tc>, window_params = [{transform_indices = @transform_0, window_bounds = array<i64: 1, 16, 64>}, {pipeline_mode = #tpu.pipeline_mode<synchronous>, transform_indices = @transform_1, window_bounds = array<i64: 1, 64>}, {pipeline_mode = #tpu.pipeline_mode<synchronous>, transform_indices = @transform_2, window_bounds = array<i64: 1, 64>}, {pipeline_mode = #tpu.pipeline_mode<synchronous>, transform_indices = @transform_3, window_bounds = array<i64: 64, 192>}, {pipeline_mode = #tpu.pipeline_mode<synchronous>, transform_indices = @transform_4, window_bounds = array<i64: 1, 192>}, {pipeline_mode = #tpu.pipeline_mode<synchronous>, transform_indices = @transform_5, window_bounds = array<i64: 64, 64>}, {pipeline_mode = #tpu.pipeline_mode<synchronous>, transform_indices = @transform_6, window_bounds = array<i64: 1, 64>}, {transform_indices = @transform_7, window_bounds = array<i64: 1, 16, 64>}]} {
    %c0 = arith.constant 0 : index
    %c0_0 = arith.constant 0 : index
    %c0_1 = arith.constant 0 : index
    %0 = vector.load %arg1[%c0, %c0_0, %c0_1] : memref<1x16x64xbf16, #tpu.memory_space<vmem>>, vector<1x16x64xbf16>
    %1 = vector.shape_cast %0 : vector<1x16x64xbf16> to vector<16x64xbf16>
    %2 = arith.extf %1 : vector<16x64xbf16> to vector<16x64xf32>
    %cst = arith.constant dense<0.000000e+00> : vector<16xf32>
    %3 = vector.multi_reduction <add>, %2, %cst [1] : vector<16x64xf32> to vector<16xf32>
    %4 = vector.shape_cast %3 : vector<16xf32> to vector<16x1xf32>
    %cst_2 = arith.constant 6.400000e+01 : f32
    %5 = vector.broadcast %cst_2 : f32 to vector<16x1xf32>
    %6 = arith.divf %4, %5 : vector<16x1xf32>
    %7 = arith.mulf %2, %2 : vector<16x64xf32>
    %cst_3 = arith.constant dense<0.000000e+00> : vector<16xf32>
    %8 = vector.multi_reduction <add>, %7, %cst_3 [1] : vector<16x64xf32> to vector<16xf32>
    %9 = vector.shape_cast %8 : vector<16xf32> to vector<16x1xf32>
    %cst_4 = arith.constant 6.400000e+01 : f32
    %10 = vector.broadcast %cst_4 : f32 to vector<16x1xf32>
    %11 = arith.divf %9, %10 : vector<16x1xf32>
    %12 = arith.mulf %6, %6 : vector<16x1xf32>
    %13 = arith.subf %11, %12 : vector<16x1xf32>
    %14 = vector.broadcast %6 : vector<16x1xf32> to vector<16x64xf32>
    %15 = arith.subf %2, %14 : vector<16x64xf32>
    %cst_5 = arith.constant 9.99999974E-6 : f32
    %16 = vector.broadcast %cst_5 : f32 to vector<16x1xf32>
    %17 = arith.addf %13, %16 : vector<16x1xf32>
    %18 = math.rsqrt %17 : vector<16x1xf32>
    %19 = vector.broadcast %18 : vector<16x1xf32> to vector<16x64xf32>
    %20 = arith.mulf %15, %19 : vector<16x64xf32>
    %c0_6 = arith.constant 0 : index
    %c0_7 = arith.constant 0 : index
    %21 = vector.load %arg2[%c0_6, %c0_7] : memref<1x64xf32, #tpu.memory_space<vmem>>, vector<1x64xf32>
    %22 = vector.broadcast %21 : vector<1x64xf32> to vector<16x64xf32>
    %23 = arith.mulf %20, %22 : vector<16x64xf32>
    %c0_8 = arith.constant 0 : index
    %c0_9 = arith.constant 0 : index
    %24 = vector.load %arg3[%c0_8, %c0_9] : memref<1x64xf32, #tpu.memory_space<vmem>>, vector<1x64xf32>
    %25 = vector.broadcast %24 : vector<1x64xf32> to vector<16x64xf32>
    %26 = arith.addf %23, %25 : vector<16x64xf32>
    %27 = arith.truncf %26 : vector<16x64xf32> to vector<16x64xbf16>
    %c0_10 = arith.constant 0 : index
    %c0_11 = arith.constant 0 : index
    %28 = vector.load %arg4[%c0_10, %c0_11] : memref<64x192xbf16, #tpu.memory_space<vmem>>, vector<64x192xbf16>
    %cst_12 = arith.constant dense<0.000000e+00> : vector<16x192xf32>
    %29 = tpu.matmul %27, %28, %cst_12 {dimension_numbers = #tpu.dot_dimension_numbers<[1], [0], [0], [1], [0, 0, 1, 1], [], []>} : vector<16x64xbf16>, vector<64x192xbf16>, vector<16x192xf32> -> vector<16x192xf32>
    %c0_13 = arith.constant 0 : index
    %c0_14 = arith.constant 0 : index
    %30 = vector.load %arg5[%c0_13, %c0_14] : memref<1x192xf32, #tpu.memory_space<vmem>>, vector<1x192xf32>
    %31 = vector.broadcast %30 : vector<1x192xf32> to vector<16x192xf32>
    %32 = arith.addf %29, %31 : vector<16x192xf32>
    %33 = tpu.iota {dimensions = array<i32: 0>} : vector<16x16xi32>
    %34 = tpu.iota {dimensions = array<i32: 1>} : vector<16x16xi32>
    %35 = arith.cmpi sle, %34, %33 : vector<16x16xi32>
    %36 = vector.extract_strided_slice %32 {offsets = [0, 0], sizes = [16, 64], strides = [1, 1]} : vector<16x192xf32> to vector<16x64xf32>
    %cst_15 = arith.constant 1.250000e-01 : f32
    %37 = vector.broadcast %cst_15 : f32 to vector<16x64xf32>
    %38 = arith.mulf %36, %37 : vector<16x64xf32>
    %39 = arith.truncf %38 : vector<16x64xf32> to vector<16x64xbf16>
    %40 = vector.extract_strided_slice %32 {offsets = [0, 64], sizes = [16, 64], strides = [1, 1]} : vector<16x192xf32> to vector<16x64xf32>
    %41 = arith.truncf %40 : vector<16x64xf32> to vector<16x64xbf16>
    %42 = vector.extract_strided_slice %32 {offsets = [0, 128], sizes = [16, 64], strides = [1, 1]} : vector<16x192xf32> to vector<16x64xf32>
    %43 = arith.truncf %42 : vector<16x64xf32> to vector<16x64xbf16>
    %cst_16 = arith.constant dense<0.000000e+00> : vector<16x16xf32>
    %44 = tpu.matmul %39, %41, %cst_16 {dimension_numbers = #tpu.dot_dimension_numbers<[1], [1], [0], [0], [0, 0, 1, 0], [], []>} : vector<16x64xbf16>, vector<16x64xbf16>, vector<16x16xf32> -> vector<16x16xf32>
    %cst_17 = arith.constant -1.000000e+30 : f32
    %45 = vector.broadcast %cst_17 : f32 to vector<16x16xf32>
    %46 = arith.select %35, %44, %45 : vector<16x16xi1>, vector<16x16xf32>
    %cst_18 = arith.constant dense<0xFF800000> : vector<16xf32>
    %47 = vector.multi_reduction <maximumf>, %46, %cst_18 [1] : vector<16x16xf32> to vector<16xf32>
    %48 = vector.shape_cast %47 : vector<16xf32> to vector<16x1xf32>
    %49 = vector.broadcast %48 : vector<16x1xf32> to vector<16x16xf32>
    %50 = arith.subf %46, %49 : vector<16x16xf32>
    %51 = math.exp %50 : vector<16x16xf32>
    %cst_19 = arith.constant dense<0.000000e+00> : vector<16xf32>
    %52 = vector.multi_reduction <add>, %51, %cst_19 [1] : vector<16x16xf32> to vector<16xf32>
    %53 = vector.shape_cast %52 : vector<16xf32> to vector<16x1xf32>
    %54 = tpu.reciprocal %53 {approx = true} : vector<16x1xf32> -> vector<16x1xf32>
    %55 = vector.broadcast %54 : vector<16x1xf32> to vector<16x16xf32>
    %56 = arith.mulf %51, %55 : vector<16x16xf32>
    %57 = arith.truncf %56 : vector<16x16xf32> to vector<16x16xbf16>
    %cst_20 = arith.constant dense<0.000000e+00> : vector<16x64xf32>
    %58 = tpu.matmul %57, %43, %cst_20 {dimension_numbers = #tpu.dot_dimension_numbers<[1], [0], [0], [1], [0, 0, 1, 1], [], []>} : vector<16x16xbf16>, vector<16x64xbf16>, vector<16x64xf32> -> vector<16x64xf32>
    %59 = arith.truncf %58 : vector<16x64xf32> to vector<16x64xbf16>
    %c0_21 = arith.constant 0 : index
    %c0_22 = arith.constant 0 : index
    %60 = vector.load %arg6[%c0_21, %c0_22] : memref<64x64xbf16, #tpu.memory_space<vmem>>, vector<64x64xbf16>
    %cst_23 = arith.constant dense<0.000000e+00> : vector<16x64xf32>
    %61 = tpu.matmul %59, %60, %cst_23 {dimension_numbers = #tpu.dot_dimension_numbers<[1], [0], [0], [1], [0, 0, 1, 1], [], []>} : vector<16x64xbf16>, vector<64x64xbf16>, vector<16x64xf32> -> vector<16x64xf32>
    %c0_24 = arith.constant 0 : index
    %c0_25 = arith.constant 0 : index
    %62 = vector.load %arg7[%c0_24, %c0_25] : memref<1x64xf32, #tpu.memory_space<vmem>>, vector<1x64xf32>
    %63 = vector.broadcast %62 : vector<1x64xf32> to vector<16x64xf32>
    %64 = arith.addf %61, %63 : vector<16x64xf32>
    %65 = arith.addf %64, %2 : vector<16x64xf32>
    %66 = arith.truncf %65 : vector<16x64xf32> to vector<16x64xbf16>
    %c0_26 = arith.constant 0 : index
    %c0_27 = arith.constant 0 : index
    %c0_28 = arith.constant 0 : index
    %67 = vector.load %arg8[%c0_26, %c0_27, %c0_28] : memref<1x16x64xbf16, #tpu.memory_space<vmem>>, vector<1x16x64xbf16>
    %68 = vector.shape_cast %67 : vector<1x16x64xbf16> to vector<16x64xbf16>
    %69 = vector.shape_cast %66 : vector<16x64xbf16> to vector<1x16x64xbf16>
    tpu.vector_store %arg8[%c0_26, %c0_27, %c0_28], %69 {strides = array<i32>} : memref<1x16x64xbf16, #tpu.memory_space<vmem>>, vector<1x16x64xbf16>,
    return
  }
  func.func @transform_0(%arg0: i32) -> (i32, i32, i32) {
    %c0_i32 = arith.constant 0 : i32
    %c0_i32_0 = arith.constant 0 : i32
    %c0_i32_1 = arith.constant 0 : i32
    return %arg0, %c0_i32, %c0_i32_0 : i32, i32, i32
  }
  func.func @transform_1(%arg0: i32) -> (i32, i32) {
    %c0_i32 = arith.constant 0 : i32
    %c0_i32_0 = arith.constant 0 : i32
    %c0_i32_1 = arith.constant 0 : i32
    return %c0_i32, %c0_i32_0 : i32, i32
  }
  func.func @transform_2(%arg0: i32) -> (i32, i32) {
    %c0_i32 = arith.constant 0 : i32
    %c0_i32_0 = arith.constant 0 : i32
    %c0_i32_1 = arith.constant 0 : i32
    return %c0_i32, %c0_i32_0 : i32, i32
  }
  func.func @transform_3(%arg0: i32) -> (i32, i32) {
    %c0_i32 = arith.constant 0 : i32
    %c0_i32_0 = arith.constant 0 : i32
    %c0_i32_1 = arith.constant 0 : i32
    return %c0_i32, %c0_i32_0 : i32, i32
  }
  func.func @transform_4(%arg0: i32) -> (i32, i32) {
    %c0_i32 = arith.constant 0 : i32
    %c0_i32_0 = arith.constant 0 : i32
    %c0_i32_1 = arith.constant 0 : i32
    return %c0_i32, %c0_i32_0 : i32, i32
  }
  func.func @transform_5(%arg0: i32) -> (i32, i32) {
    %c0_i32 = arith.constant 0 : i32
    %c0_i32_0 = arith.constant 0 : i32
    %c0_i32_1 = arith.constant 0 : i32
    return %c0_i32, %c0_i32_0 : i32, i32
  }
  func.func @transform_6(%arg0: i32) -> (i32, i32) {
    %c0_i32 = arith.constant 0 : i32
    %c0_i32_0 = arith.constant 0 : i32
    %c0_i32_1 = arith.constant 0 : i32
    return %c0_i32, %c0_i32_0 : i32, i32
  }
  func.func @transform_7(%arg0: i32) -> (i32, i32, i32) {
    %c0_i32 = arith.constant 0 : i32
    %c0_i32_0 = arith.constant 0 : i32
    %c0_i32_1 = arith.constant 0 : i32
    return %arg0, %c0_i32, %c0_i32_0 : i32, i32, i32
  }
}

</mosaic_0001>

<bundles_post_ra>
// kernel: text_encoder_forward.9
= control target key start
LH: loop header
LB: loop body
LE: loop exit
PB: predicated region body
PF: predicated region fallthrough
CT: control target
= control target key end

     0   :  { %vm21_vm0 = vcmask 517120   ;;  %s265_s0 = inlined_call_operand.vmem [shape: bf16[2,64], index: 0, kind: input, shape index: {}]   ;;  %s266_s1 = inlined_call_operand.vmem [shape: f32[1,64], index: 1, kind: input, shape index: {}]   ;;  %s267_s2 = inlined_call_operand.vmem [shape: f32[1,64], index: 2, kind: input, shape index: {}]   ;;  %s268_s3 = inlined_call_operand.vmem [shape: bf16[64,32], index: 3, kind: input, shape index: {}]   ;;  %s269_s4 = inlined_call_operand.hbm [shape: f32[2,32], index: 4, kind: output, shape index: {}]  }
   0x1   :  { %v19_v0 = vld [vmem:[%s265_s0] sm:$0x1] }
   0x2   :  { %v20_v1 = vunpack.c.l.bf16 %v19_v0 }
   0x4   :  { %v22_v2 = vsel %vm21_vm0, %v20_v1, 0.0  ;;  %v27_v3 = vmul.f32 %v20_v1, %v20_v1 }
   0x5   :  { %9 = vsyncpa [#allocation3], 0  ;;  %23 = vadd.xlane.f32.xlu0 %v22_v2  ;;  %v174_v5 = vld [vmem:[%s268_s3] sm:$0xff]   ;;  %v204_v6 = vmov 0.0   ;;  %vm205_vm1 = vmmov 0   ;;  %v175_v7 = vld [vmem:[%s268_s3 + $0x8] sm:$0xff]  }
   0x6   :  { %v28_v4 = vsel %vm21_vm0, %v27_v3, 0.0  ;;  %159 = vmatprep.subr.bf16.mxu0 %v204_v6  ;;  %167 = vmatprep.mubr.msk.bf16.mxu0 %vm205_vm1, %v204_v6  ;;  %v176_v8 = vld [vmem:[%s268_s3 + $0x10] sm:$0xff]   ;;  %v177_v9 = vld [vmem:[%s268_s3 + $0x18] sm:$0xff]   ;;  %v147_v19 = vld [vmem:[%s266_s1] ss:$0 sm:$0xff]  ;;  %vm87_vm2 = vcmask 523264  }
   0x7   :  { %160 = vmatpush3.bf16.msra.mxu0 %v174_v5  ;;  %v148_v21 = vld [vmem:[%s267_s2] ss:$0 sm:$0xff]  ;;  %s206_s3 = smov [#allocation2]   ;;  %vm131_vm3 = vcmask 254976  }
   0x8   :  { %161 = vmatprep.subr.bf16.mxu0 %v204_v6  ;;  %s139_s28 = sshll.u32 %s206_s3, 4  ;;  %s140_s28 = int_to_ptr.vmem [resolvable:$true] %s139_s28 }
   0x9   :  { %29 = vadd.xlane.f32.xlu0 %v28_v4  ;;  %s180_s29 = scalar_lea.vmem %s140_s28, 32  ;;  %p185_p1 = scmp.lt.s32.totalorder %s140_s28, %s140_s28 }
   0xa   :  { %p181_p0 = scmp.ne.s32.totalorder %s140_s28, %s180_s29  ;;  %p186_p2 = scmp.lt.s32.totalorder %s180_s29, %s180_s29 }
   0xb   :  { %162 = vmatpush3.bf16.msra.mxu0 %v175_v7 }
   0xc   :  { %163 = vmatprep.subr.bf16.mxu0 %v204_v6  ;;  %p187_p3 = por %p186_p2, %p185_p1 }
   0xe   :  { %p188_p4 = pnand %p187_p3, %p181_p0 }
   0xf   :  { %164 = vmatpush3.bf16.msra.mxu0 %v176_v8 }
  0x10   :  { %165 = vmatprep.subr.bf16.mxu0 %v204_v6 }
  0x13   :  { %166 = vmatpush3.bf16.msra.mxu0 %v177_v9 }
  0x92   :  { %v24_v10 = vpop.xlane.xlu0 %23 }
  0x93   :  { %v26_v11 = vmul.f32 0.015625, %v24_v10 }
  0x95   :  { %v32_v13 = vmul.f32 %v26_v11, %v26_v11  ;;  %v34_v17 = vsub.f32 %v20_v1, %v26_v11 }
  0x96   :  { %v30_v12 = vpop.xlane.xlu0 %29 }
  0x97   :  { %v31_v14 = vmul.f32 0.015625, %v30_v12 }
  0x99   :  { %v33_v15 = vsub.f32 %v31_v14, %v32_v13 }
  0x9b   :  { %v35_v16 = vadd.f32 1e-05, %v33_v15 }
  0x9d   :  { %178 = vrsqrt.f32 %v35_v16 }
  0xa7   :  { %v179_v18 = vpop.eup %178 }
  0xa8   :  { %v37_v20 = vmul.f32 %v179_v18, %v34_v17 }
  0xaa   :  { %v45_v22 = vmul.f32 %v147_v19, %v37_v20 }
  0xac   :  { %v53_v23 = vadd.f32 %v148_v21, %v45_v22 }
  0xae   :  { %v54_v24 = vpack.c.bf16 %v53_v23, %v53_v23 }
  0xb0   :  { %168 = vmatmul.mubr.msk.bf16.vlgmr.msra.gmra.mrb[0].mxu0 %vm87_vm2, %v54_v24 }
 0x183   :  { %v125_v25 = vpop.f32.mrb[0].mxu0 }
 0x184   :  { %132 = vst.msk [vmem:[#allocation2] sm:$0x3] %vm131_vm3, %v125_v25  ;;  %v169_v26 = vpop.f32.mrb[1].mxu0 }
 0x185   :  { %v128_v27 = vpop.f32.mrb[2].mxu0 }
 0x186   :  { %191 = shalt.err (!%p188_p4)
}
 0x187   :  { %s192_s30 = scalar_lea.hbm %s269_s4, 32 }
 0x188   :  { %p193_p5 = scmp.ne.s32.totalorder %s269_s4, %s192_s30  ;;  %p196_p6 = scmp.lt.u32.totalorder %s192_s30, %s269_s4 }
 0x18a   :  { %p198_p7 = pnand %p196_p6, %p193_p5 }
 0x18c   :  { %201 = shalt.err (!%p198_p7)
}
 0x18d   :  { %142 = dma.vmem_to_hbm [thread:$0]  %s140_s28, 32, %s269_s4, [#allocation3]   ;;  %v170_v28 = vpop.f32.mrb[3].mxu0 }
 0x18e   :  { %202 = dma.done.wait [#allocation3], 32  }
 0x18f   :  { %203 = vsyncadd [#allocation3], 4294967264 }
 0x190   :  { %146 = vsyncpa [#allocation3], 1 }

// kernel: text_encoder_forward.6
= control target key start
LH: loop header
LB: loop body
LE: loop exit
PB: predicated region body
PF: predicated region fallthrough
CT: control target
= control target key end

     0   :  { %s902_s24 = smov 0   ;;  %s1029_s0 = inlined_call_operand.vmem [shape: bf16[32,64], index: 0, kind: input, shape index: {}]   ;;  %s1030_s1 = inlined_call_operand.vmem [shape: f32[1,64], index: 1, kind: input, shape index: {}]   ;;  %s1031_s2 = inlined_call_operand.vmem [shape: f32[1,64], index: 2, kind: input, shape index: {}]   ;;  %s1032_s3 = inlined_call_operand.vmem [shape: bf16[64,256], index: 3, kind: input, shape index: {}]   ;;  %s1033_s4 = inlined_call_operand.vmem [shape: f32[1,256], index: 4, kind: input, shape index: {}]   ;;  %s1034_s5 = inlined_call_operand.vmem [shape: bf16[256,64], index: 5, kind: input, shape index: {}]   ;;  %s1035_s6 = inlined_call_operand.vmem [shape: f32[1,64], index: 6, kind: input, shape index: {}]   ;;  %s1036_s7 = inlined_call_operand.vmem [shape: bf16[32,64], index: 7, kind: output, shape index: {}]  }
   0x1 LB: > { %s723_s25 = sadd.s32 4294967295, %s859_s24   ;;  %p727_p0 = scmp.ge.s32.totalorder %s859_s24, 1  ;;  %s859_s24 = sphi %s902_s24, %s17_s24  }
   0x2   : > { %p238_p1 = scmp.lt.s32.totalorder %s859_s24, 3 }
   0x4   : > { %p239_p2 = pnand %p727_p0, %p238_p1 }
   0x5   : > { %s728_s26 = sshll.u32 (!%p239_p2), %s723_s25, 1  ;;  %vm287_vm0 = vcmask (!%p239_p2), 523264   ;;  %v805_v9 = vld [vmem:[%s1032_s3 + $0x4] ss:$8 sps:$4 sm:$0xff] (!%p239_p2)   ;;  %v807_v10 = vld [vmem:[%s1032_s3] ss:$8 sps:$4 sm:$0xff] (!%p239_p2)   ;;  %v348_v61 = vlaneseq (!%p239_p2) }
   0x6   : > { %242 = sbr.rel (%p239_p2) target bundleno = 667 (0x29b), region = 48  ;;  %p271_p3 = scmp.lt.s32.totalorder (!%p239_p2), %s728_s26, 3  ;;  %v808_v11 = vld [vmem:[%s1032_s3 + $0x14] ss:$8 sps:$4 sm:$0xff] (!%p239_p2)   ;;  %401 = vmatprep.subr.bf16.mxu0 (!%p239_p2), %v805_v9  ;;  %v810_v12 = vld [vmem:[%s1032_s3 + $0x10] ss:$8 sps:$4 sm:$0xff] (!%p239_p2)  }
   0x7   : > { %402 = vmatpush1.bf16.msra.mxu0 (!%p239_p2), %v807_v10  ;;  %v861_v13 = vmov (!%p239_p2), 0   ;;  %v811_v14 = vld [vmem:[%s1032_s3 + $0x24] ss:$8 sps:$4 sm:$0xff] (!%p239_p2)   ;;  %v813_v15 = vld [vmem:[%s1032_s3 + $0x20] ss:$8 sps:$4 sm:$0xff] (!%p239_p2)   ;;  %v821_v49 = vld [vmem:[%s1034_s5 + $0x50] sm:$0xff] (!%p239_p2)  }
   0x8   : > { %433 = vmatprep.mubr.bf16.mxu0 (!%p239_p2), %v861_v13  ;;  %403 = vmatprep.subr.bf16.mxu0 (!%p239_p2), %v808_v11  ;;  %v814_v16 = vld [vmem:[%s1032_s3 + $0x34] ss:$8 sps:$4 sm:$0xff] (!%p239_p2)   ;;  %v816_v17 = vld [vmem:[%s1032_s3 + $0x30] ss:$8 sps:$4 sm:$0xff] (!%p239_p2)   ;;  %v732_v35 = vld [vmem:[%s1030_s1] ss:$0 sm:$0xff] (!%p239_p2) }
   0x9   : > { %v733_v40 = vld [vmem:[%s1031_s2] ss:$0 sm:$0xff] (!%p239_p2)  ;;  %v819_v47 = vld [vmem:[%s1034_s5 + $0x48] sm:$0xff] (!%p239_p2)   ;;  %v822_v50 = vld [vmem:[%s1034_s5 + $0x10] sm:$0xff] (!%p239_p2)   ;;  %v349_v62 = vshrl.u32 (!%p239_p2), %v348_v61, 7  ;;  %vm664_vm1 = vcmask (!%p239_p2), 519168  }
   0xa   : > { %v817_v45 = vld [vmem:[%s1034_s5 + $0x40] sm:$0xff] (!%p239_p2)   ;;  %v820_v48 = vld [vmem:[%s1034_s5 + $0x8] sm:$0xff] (!%p239_p2)   ;;  %v823_v51 = vld [vmem:[%s1034_s5 + $0x58] sm:$0xff] (!%p239_p2)  }
   0xb   : > { %404 = vmatpush1.bf16.msra.mxu0 (!%p239_p2), %v810_v12  ;;  %v818_v46 = vld [vmem:[%s1034_s5] sm:$0xff] (!%p239_p2)   ;;  %774 = vmatprep.subr.bf16.mxu1 (!%p239_p2), %v817_v45  ;;  %v824_v52 = vld [vmem:[%s1034_s5 + $0x18] sm:$0xff] (!%p239_p2)   ;;  %v827_v55 = vld [vmem:[%s1034_s5 + $0x68] sm:$0xff] (!%p239_p2)   ;;  %v350_v63 = vsub.s32 (!%p239_p2), 0, %v349_v62 }
   0xc   : > { %405 = vmatprep.subr.bf16.mxu0 (!%p239_p2), %v811_v14  ;;  %775 = vmatpush3.bf16.msra.mxu1 (!%p239_p2), %v818_v46  ;;  %v825_v53 = vld [vmem:[%s1034_s5 + $0x60] sm:$0xff] (!%p239_p2)   ;;  %v828_v56 = vld [vmem:[%s1034_s5 + $0x28] sm:$0xff] (!%p239_p2)   ;;  %v829_v57 = vld [vmem:[%s1034_s5 + $0x70] sm:$0xff] (!%p239_p2)  }
   0xd   : > { %s1038_s26 = smov (!%p271_p3, %s728_s26), 3  ;;  %776 = vmatprep.subr.bf16.mxu1 %v819_v47  ;;  %v826_v54 = vld [vmem:[%s1034_s5 + $0x20] sm:$0xff]   ;;  %v830_v58 = vld [vmem:[%s1034_s5 + $0x30] sm:$0xff]   ;;  %v831_v59 = vld [vmem:[%s1034_s5 + $0x78] sm:$0xff]  }
   0xe   : > { %s729_s27 = sshll.u32 %s1038_s26, 2  ;;  %v832_v60 = vld [vmem:[%s1034_s5 + $0x38] sm:$0xff]  }
   0xf   : > { %s274_s30 = scalar_lea.vmem %s1029_s0, %s729_s27  ;;  %406 = vmatpush1.bf16.msra.mxu0 %v813_v15  ;;  %s280_s29 = scalar_lea.vmem %s1036_s7, %s729_s27 }
  0x10   : > { %v771_v0 = vld [vmem:[%s274_s30] sm:$0xff]   ;;  %407 = vmatprep.subr.bf16.mxu0 %v814_v16  ;;  %777 = vmatpush3.bf16.msra.mxu1 %v820_v48 }
  0x11   : > { %v918_v1 = vunpack.c.l.bf16 %v771_v0  ;;  %v920_v2 = vunpack.c.h.bf16 %v771_v0  ;;  %778 = vmatprep.subr.bf16.mxu1 %v821_v49  ;;  %v346_v0 = vld [vmem:[%s1033_s4] sm:$0x3] }
  0x13   : > { %v288_v3 = vsel %vm287_vm0, %v918_v1, 0.0  ;;  %v297_v4 = vmul.f32 %v918_v1, %v918_v1  ;;  %v291_v5 = vsel %vm287_vm0, %v920_v2, 0.0  ;;  %v298_v6 = vmul.f32 %v920_v2, %v920_v2  ;;  %408 = vmatpush1.bf16.msra.mxu0 %v816_v17 }
  0x14   : > { %289 = vadd.xlane.f32.xlu0 %v288_v3  ;;  %779 = vmatpush3.bf16.msra.mxu1 %v822_v50  ;;  %v354_v3 = vsub.s32 1, %v349_v62 }
  0x15   : > { %v299_v7 = vsel %vm287_vm0, %v297_v4, 0.0  ;;  %v302_v8 = vsel %vm287_vm0, %v298_v6, 0.0  ;;  %780 = vmatprep.subr.bf16.mxu1 %v823_v51  ;;  %v351_v4 = vrot.slane %v346_v0, %v350_v63 }
  0x16   : > { %300 = vadd.xlane.f32.xlu1 %v299_v7 }
  0x18   : > { %292 = vadd.xlane.f32.xlu0 %v291_v5  ;;  %781 = vmatpush3.bf16.msra.mxu1 %v824_v52  ;;  %v355_v5 = vrot.slane %v346_v0, %v354_v3 }
  0x19   : > { %782 = vmatprep.subr.bf16.mxu1 %v825_v53 }
  0x1a   : > { %303 = vadd.xlane.f32.xlu1 %v302_v8 }
  0x1c   : > { %783 = vmatpush3.bf16.msra.mxu1 %v826_v54 }
  0x1d   : > { %784 = vmatprep.subr.bf16.mxu1 %v827_v55 }
  0x20   : > { %785 = vmatpush3.bf16.msra.mxu1 %v828_v56 }
  0x21   : > { %786 = vmatprep.subr.bf16.mxu1 %v829_v57 }
  0x24   : > { %787 = vmatpush3.bf16.msra.mxu1 %v830_v58 }
  0x25   : > { %788 = vmatprep.subr.bf16.mxu1 %v831_v59 }
  0x28   : > { %789 = vmatpush3.bf16.msra.mxu1 %v832_v60 }
  0xa1   : > { %v290_v18 = vpop.xlane.xlu0 %289 }
  0xa2   : > { %v295_v19 = vmul.f32 0.015625, %v290_v18 }
  0xa3   : > { %v301_v20 = vpop.xlane.xlu1 %300 }
  0xa4   : > { %v307_v21 = vmul.f32 %v295_v19, %v295_v19  ;;  %v305_v22 = vmul.f32 0.015625, %v301_v20  ;;  %v311_v32 = vsub.f32 %v918_v1, %v295_v19 }
  0xa5   : > { %v293_v23 = vpop.xlane.xlu0 %292 }
  0xa6   : > { %v309_v24 = vsub.f32 %v305_v22, %v307_v21  ;;  %v296_v25 = vmul.f32 0.015625, %v293_v23 }
  0xa7   : > { %v304_v26 = vpop.xlane.xlu1 %303 }
  0xa8   : > { %v313_v27 = vadd.f32 1e-05, %v309_v24  ;;  %v308_v28 = vmul.f32 %v296_v25, %v296_v25  ;;  %v306_v29 = vmul.f32 0.015625, %v304_v26  ;;  %v312_v36 = vsub.f32 %v920_v2, %v296_v25 }
  0xaa   : > { %833 = vrsqrt.f32 %v313_v27  ;;  %v310_v30 = vsub.f32 %v306_v29, %v308_v28 }
  0xac   : > { %v314_v31 = vadd.f32 1e-05, %v310_v30 }
  0xae   : > { %835 = vrsqrt.f32 %v314_v31 }
  0xb4   : > { %v834_v33 = vpop.eup %833 }
  0xb5   : > { %v317_v34 = vmul.f32 %v834_v33, %v311_v32 }
  0xb7   : > { %v326_v39 = vmul.f32 %v732_v35, %v317_v34 }
  0xb8   : > { %v836_v37 = vpop.eup %835 }
  0xb9   : > { %v318_v38 = vmul.f32 %v836_v37, %v312_v36  ;;  %v335_v42 = vadd.f32 %v733_v40, %v326_v39 }
  0xbb   : > { %v327_v41 = vmul.f32 %v732_v35, %v318_v38 }
  0xbd   : > { %v336_v43 = vadd.f32 %v733_v40, %v327_v41  ;;  %v747_v41 = vld [vmem:[%s1035_s6] ss:$0 sm:$0xff] }
  0xbf   : > { %v337_v44 = vpack.c.bf16 %v336_v43, %v335_v42 }
  0xc1   : > { %742 = vmatmul.mubr.msk.bf16.vlgmr.msra.gmra.mrb[0].mxu0 %vm287_vm0, %v337_v44 }
 0x194   : > { %v435_v6 = vpop.f32.mrb[0].mxu0 }
 0x195   : > { %v436_v7 = vadd.f32 %v435_v6, %v351_v4  ;;  %v437_v8 = vpop.f32.mrb[1].mxu0 }
 0x196   : > { %v438_v9 = vadd.f32 %v437_v8, %v355_v5  ;;  %v439_v10 = vpop.f32.mrb[2].mxu0 }
 0x197   : > { %v743_v11 = vmul.f32 -1.702, %v436_v7  ;;  %v440_v12 = vadd.f32 %v439_v10, %v351_v4  ;;  %v441_v13 = vpop.f32.mrb[3].mxu0 }
 0x198   : > { %v744_v14 = vmul.f32 -1.702, %v438_v9  ;;  %v442_v15 = vadd.f32 %v441_v13, %v355_v5 }
 0x199   : > { %v452_v16 = vmul.f32 1.442695, %v743_v11  ;;  %v745_v17 = vmul.f32 -1.702, %v440_v12 }
 0x19a   : > { %v454_v18 = vmul.f32 1.442695, %v744_v14  ;;  %v746_v19 = vmul.f32 -1.702, %v442_v15 }
 0x19b   : > { %837 = vpow2.f32 %v452_v16  ;;  %v456_v20 = vmul.f32 1.442695, %v745_v17 }
 0x19c   : > { %839 = vpow2.f32 %v454_v18  ;;  %v458_v21 = vmul.f32 1.442695, %v746_v19 }
 0x19d   : > { %841 = vpow2.f32 %v456_v20 }
 0x19e   : > { %843 = vpow2.f32 %v458_v21 }
 0x1a5   : > { %v838_v22 = vpop.eup %837 }
 0x1a6   : > { %v840_v23 = vpop.eup %839  ;;  %v460_v24 = vadd.f32 1.0, %v838_v22 }
 0x1a7   : > { %v842_v25 = vpop.eup %841  ;;  %v461_v26 = vadd.f32 1.0, %v840_v23 }
 0x1a8   : > { %v844_v27 = vpop.eup %843  ;;  %845 = vrcp.f32 %v460_v24  ;;  %v462_v28 = vadd.f32 1.0, %v842_v25 }
 0x1a9   : > { %847 = vrcp.f32 %v461_v26  ;;  %v463_v29 = vadd.f32 1.0, %v844_v27 }
 0x1aa   : > { %849 = vrcp.f32 %v462_v28 }
 0x1ab   : > { %851 = vrcp.f32 %v463_v29 }
 0x1b2   : > { %v846_v30 = vpop.eup %845 }
 0x1b3   : > { %v848_v31 = vpop.eup %847  ;;  %v472_v34 = vmul.f32 %v846_v30, %v436_v7 }
 0x1b4   : > { %v850_v32 = vpop.eup %849  ;;  %v473_v36 = vmul.f32 %v848_v31, %v438_v9 }
 0x1b5   : > { %v852_v33 = vpop.eup %851  ;;  %v474_v35 = vmul.f32 %v850_v32, %v440_v12 }
 0x1b6   : > { %v475_v37 = vmul.f32 %v852_v33, %v442_v15 }
 0x1b7   : > { %v476_v38 = vpack.c.bf16 %v474_v35, %v472_v34 }
 0x1b8   : > { %v477_v39 = vpack.c.bf16 %v475_v37, %v473_v36 }
 0x1ba   : > { %645 = vmatprep.mubr.bf16.mxu1 %v477_v39 }
 0x1bb   : > { %646 = vmatmul.mubr.bf16.vlgmr.msra.gmra.mrb[0].mxu1 %v476_v38 }
 0x28e   : > { %v790_v40 = vpop.f32.mrb[0].mxu1 }
 0x28f   : > { %v791_v42 = vpop.f32.mrb[1].mxu1 }
 0x290   : > { %v792_v43 = vadd.f32 %v791_v42, %v790_v40  ;;  %v793_v44 = vpop.f32.mrb[2].mxu1 }
 0x291   : > { %v794_v45 = vpop.f32.mrb[3].mxu1 }
 0x292   : > { %v648_v46 = vadd.f32 %v792_v43, %v747_v41  ;;  %v795_v47 = vadd.f32 %v794_v45, %v793_v44 }
 0x294   : > { %v654_v48 = vadd.f32 %v918_v1, %v648_v46  ;;  %v651_v49 = vadd.f32 %v795_v47, %v747_v41 }
 0x296   : > { %v768_v50 = vpack.c.bf16 %v654_v48, %v654_v48  ;;  %v655_v51 = vadd.f32 %v920_v2, %v651_v49 }
 0x298   : > { %665 = vst.msk [vmem:[%s280_s29] sm:$0xf] %vm664_vm1, %v768_v50  ;;  %v769_v52 = vpack.c.bf16 %v655_v51, %v655_v51 }
 0x29a   : > { %666 = vst.msk [vmem:[%s280_s29 + $0x4] sm:$0xf] %vm664_vm1, %v769_v52 }
 0x29b PF: > { %s17_s24 = sadd.s32 1, %s859_s24  }
 0x29c   : > { %p14_p4 = scmp.ge.s32.totalorder %s17_s24, 4  }
 0x29e   :  { %16 = sbr.rel (!%p14_p4) target bundleno = 1 (0x1), region = 78 }

// kernel: text_encoder_forward.5
= control target key start
LH: loop header
LB: loop body
LE: loop exit
PB: predicated region body
PF: predicated region fallthrough
CT: control target
= control target key end

     0   :  { %s890_s24 = smov 0   ;;  %s1001_s0 = inlined_call_operand.vmem [shape: bf16[2,16,64], index: 0, kind: input, shape index: {}]   ;;  %s1002_s1 = inlined_call_operand.vmem [shape: f32[1,64], index: 1, kind: input, shape index: {}]   ;;  %s1003_s2 = inlined_call_operand.vmem [shape: f32[1,64], index: 2, kind: input, shape index: {}]   ;;  %s1004_s3 = inlined_call_operand.vmem [shape: bf16[64,192], index: 3, kind: input, shape index: {}]   ;;  %s1005_s4 = inlined_call_operand.vmem [shape: f32[1,192], index: 4, kind: input, shape index: {}]   ;;  %s1006_s5 = inlined_call_operand.vmem [shape: bf16[64,64], index: 5, kind: input, shape index: {}]   ;;  %s1007_s6 = inlined_call_operand.vmem [shape: f32[1,64], index: 6, kind: input, shape index: {}]   ;;  %s1008_s7 = inlined_call_operand.vmem [shape: bf16[2,16,64], index: 7, kind: output, shape index: {}]  }
   0x1 LB: > { %s725_s25 = sadd.s32 4294967295, %s844_s24   ;;  %p729_p0 = scmp.ge.s32.totalorder %s844_s24, 1  ;;  %s844_s24 = sphi %s890_s24, %s17_s24  }
   0x2   : > { %p237_p1 = scmp.lt.s32.totalorder %s844_s24, 3 }
   0x4   : > { %p238_p2 = pnand %p729_p0, %p237_p1 }
   0x5   : > { %p269_p3 = scmp.lt.s32.totalorder (!%p238_p2), %s725_s25, 1  ;;  %vm284_vm0 = vcmask (!%p238_p2), 523264   ;;  %v810_v9 = vld [vmem:[%s1004_s3 + $0x4] ss:$8 sps:$4 sm:$0xff] (!%p238_p2)   ;;  %v812_v10 = vld [vmem:[%s1004_s3] ss:$8 sps:$4 sm:$0xff] (!%p238_p2)   ;;  %v345_v45 = vlaneseq (!%p238_p2) }
   0x6   : > { %241 = sbr.rel (%p238_p2) target bundleno = 1504 (0x5e0), region = 48  ;;  %v813_v11 = vld [vmem:[%s1004_s3 + $0x14] ss:$8 sps:$4 sm:$0xff] (!%p238_p2)   ;;  %398 = vmatprep.subr.bf16.mxu0 (!%p238_p2), %v810_v9  ;;  %v815_v12 = vld [vmem:[%s1004_s3 + $0x10] ss:$8 sps:$4 sm:$0xff] (!%p238_p2)   ;;  %v846_v13 = vmov (!%p238_p2), 0  }
   0x7   : > { %399 = vmatpush1.bf16.msra.mxu0 (!%p238_p2), %v812_v10  ;;  %430 = vmatprep.mubr.bf16.mxu0 (!%p238_p2), %v846_v13  ;;  %v816_v14 = vld [vmem:[%s1004_s3 + $0x24] ss:$8 sps:$4 sm:$0xff] (!%p238_p2)   ;;  %v818_v15 = vld [vmem:[%s1004_s3 + $0x20] ss:$8 sps:$4 sm:$0xff] (!%p238_p2)   ;;  %v819_v16 = vld [vmem:[%s1004_s3 + $0x34] ss:$8 sps:$4 sm:$0xff] (!%p238_p2)  }
   0x8   : > { %400 = vmatprep.subr.bf16.mxu0 (!%p238_p2), %v813_v11  ;;  %v821_v17 = vld [vmem:[%s1004_s3 + $0x30] ss:$8 sps:$4 sm:$0xff] (!%p238_p2)   ;;  %v734_v35 = vld [vmem:[%s1002_s1] ss:$0 sm:$0xff] (!%p238_p2)  ;;  %v346_v46 = vshrl.u32 (!%p238_p2), %v345_v45, 7  ;;  %v847_v49 = vmov (!%p238_p2), 0.0  }
   0x9   : > { %v735_v40 = vld [vmem:[%s1003_s2] ss:$0 sm:$0xff] (!%p238_p2)  ;;  %774 = vmatprep.subr.bf16.mxu1 (!%p238_p2), %v847_v49  ;;  %vm848_vm1 = vmmov (!%p238_p2), 0   ;;  %s849_s9 = smov (!%p238_p2), 64   ;;  %vm505_vm3 = vcmask (!%p238_p2), 130048   ;;  %vm667_vm5 = vcmask (!%p238_p2), 519168  }
   0xa   : > { %v347_v47 = vsub.s32 (!%p238_p2), 0, %v346_v46  ;;  %v343_v48 = vld [vmem:[%s1005_s4] sm:$0x3] (!%p238_p2)  ;;  %v351_v50 = vsub.s32 (!%p238_p2), 1, %v346_v46  ;;  %776 = vmatprep.mubr.msk.bf16.mxu1 (!%p238_p2), %vm848_vm1, %v847_v49 }
   0xb   : > { %401 = vmatpush1.bf16.msra.mxu0 (!%p238_p2), %v815_v12 }
   0xc   : > { %402 = vmatprep.subr.bf16.mxu0 (!%p238_p2), %v816_v14  ;;  %v348_v51 = vrot.slane (!%p238_p2), %v343_v48, %v347_v47  ;;  %v352_v53 = vrot.slane (!%p238_p2), %v343_v48, %v351_v50 }
   0xd   : > { %s1010_s25 = smov (!%p269_p3, %s725_s25), 1 }
   0xe   : > { %s757_s26 = sshll.u32 %s1010_s25, 3 }
   0xf   : > { %s273_s29 = scalar_lea.vmem %s1001_s0, %s757_s26  ;;  %403 = vmatpush1.bf16.msra.mxu0 %v818_v15  ;;  %s278_s22 = scalar_lea.vmem %s1008_s7, %s757_s26 }
  0x10   : > { %v762_v0 = vld [vmem:[%s273_s29] sm:$0xff]   ;;  %404 = vmatprep.subr.bf16.mxu0 %v819_v16 }
  0x11   : > { %v906_v1 = vunpack.c.l.bf16 %v762_v0  ;;  %v908_v2 = vunpack.c.h.bf16 %v762_v0 }
  0x13   : > { %v285_v3 = vsel %vm284_vm0, %v906_v1, 0.0  ;;  %v294_v4 = vmul.f32 %v906_v1, %v906_v1  ;;  %v295_v5 = vmul.f32 %v908_v2, %v908_v2  ;;  %v288_v7 = vsel %vm284_vm0, %v908_v2, 0.0  ;;  %405 = vmatpush1.bf16.msra.mxu0 %v821_v17 }
  0x14   : > { %286 = vadd.xlane.f32.xlu0 %v285_v3  ;;  %786 = vmatprep.subr.bf16.mxu0 %v847_v49 }
  0x15   : > { %v296_v6 = vsel %vm284_vm0, %v294_v4, 0.0  ;;  %v299_v8 = vsel %vm284_vm0, %v295_v5, 0.0 }
  0x16   : > { %297 = vadd.xlane.f32.xlu1 %v296_v6  ;;  %v445_v6 = vand.u32 127, %v345_v45 }
  0x18   : > { %289 = vadd.xlane.f32.xlu0 %v288_v7  ;;  %v443_v7 = vadd.s32 8, %v346_v46  ;;  %vm446_vm2 = vcmp.le.s32.totalorder %v445_v6, %v346_v46 }
  0x1a   : > { %300 = vadd.xlane.f32.xlu1 %v299_v8  ;;  %vm447_vm4 = vcmp.le.s32.totalorder %v445_v6, %v443_v7 }
  0xa1   : > { %v287_v18 = vpop.xlane.xlu0 %286 }
  0xa2   : > { %v292_v19 = vmul.f32 0.015625, %v287_v18 }
  0xa3   : > { %v298_v20 = vpop.xlane.xlu1 %297 }
  0xa4   : > { %v304_v21 = vmul.f32 %v292_v19, %v292_v19  ;;  %v302_v22 = vmul.f32 0.015625, %v298_v20  ;;  %v308_v32 = vsub.f32 %v906_v1, %v292_v19 }
  0xa5   : > { %v290_v23 = vpop.xlane.xlu0 %289 }
  0xa6   : > { %v306_v24 = vsub.f32 %v302_v22, %v304_v21  ;;  %v293_v25 = vmul.f32 0.015625, %v290_v23 }
  0xa7   : > { %v301_v26 = vpop.xlane.xlu1 %300 }
  0xa8   : > { %v310_v27 = vadd.f32 1e-05, %v306_v24  ;;  %v305_v28 = vmul.f32 %v293_v25, %v293_v25  ;;  %v303_v29 = vmul.f32 0.015625, %v301_v26  ;;  %v309_v36 = vsub.f32 %v908_v2, %v293_v25  ;;  %v822_v26 = vld [vmem:[%s1006_s5] sm:$0xff]  }
  0xaa   : > { %826 = vrsqrt.f32 %v310_v27  ;;  %v307_v30 = vsub.f32 %v303_v29, %v305_v28  ;;  %v823_v27 = vld [vmem:[%s1006_s5 + $0x8] sm:$0xff]   ;;  %v824_v28 = vld [vmem:[%s1006_s5 + $0x10] sm:$0xff]  }
  0xac   : > { %v311_v31 = vadd.f32 1e-05, %v307_v30 }
  0xae   : > { %828 = vrsqrt.f32 %v311_v31 }
  0xb4   : > { %v827_v33 = vpop.eup %826 }
  0xb5   : > { %v314_v34 = vmul.f32 %v827_v33, %v308_v32 }
  0xb7   : > { %v323_v39 = vmul.f32 %v734_v35, %v314_v34 }
  0xb8   : > { %v829_v37 = vpop.eup %828 }
  0xb9   : > { %v315_v38 = vmul.f32 %v829_v37, %v309_v36  ;;  %v332_v42 = vadd.f32 %v735_v40, %v323_v39  ;;  %v825_v36 = vld [vmem:[%s1006_s5 + $0x18] sm:$0xff]  }
  0xbb   : > { %v324_v41 = vmul.f32 %v734_v35, %v315_v38 }
  0xbd   : > { %v333_v43 = vadd.f32 %v735_v40, %v324_v41 }
  0xbf   : > { %v334_v44 = vpack.c.bf16 %v333_v43, %v332_v42  ;;  %v747_v42 = vld [vmem:[%s1007_s6] ss:$0 sm:$0xff] }
  0xc1   : > { %744 = vmatmul.mubr.msk.bf16.vlgmr.msra.gmra.mrb[0].mxu0 %vm284_vm0, %v334_v44 }
  0xc2   : > { %794 = vmatprep.mubr.msk.bf16.mxu0 %vm848_vm1, %v847_v49  ;;  %787 = vmatpush3.bf16.msra.mxu0 %v822_v26 }
  0xc3   : > { %788 = vmatprep.subr.bf16.mxu0 %v847_v49 }
  0xc6   : > { %789 = vmatpush3.bf16.msra.mxu0 %v823_v27 }
  0xc7   : > { %790 = vmatprep.subr.bf16.mxu0 %v847_v49 }
  0xca   : > { %791 = vmatpush3.bf16.msra.mxu0 %v824_v28 }
  0xcb   : > { %792 = vmatprep.subr.bf16.mxu0 %v847_v49 }
  0xce   : > { %793 = vmatpush3.bf16.msra.mxu0 %v825_v36 }
 0x194   : > { %v432_v52 = vpop.f32.mrb[0].mxu0 }
 0x195   : > { %v433_v54 = vadd.f32 %v432_v52, %v348_v51  ;;  %v434_v55 = vpop.f32.mrb[1].mxu0 }
 0x196   : > { %v436_v56 = vpop.f32.mrb[2].mxu0  ;;  %v435_v59 = vadd.f32 %v434_v55, %v352_v53 }
 0x197   : > { %v437_v57 = vadd.f32 %v436_v56, %v348_v51  ;;  %v438_v58 = vpop.f32.mrb[3].mxu0  ;;  %v448_v61 = vmul.f32 0.125, %v433_v54 }
 0x198   : > { %v439_v60 = vadd.f32 %v438_v58, %v352_v53 }
 0x199   : > { %v449_v62 = vmul.f32 0.125, %v437_v57  ;;  %v451_v63 = vpack.c.bf16 %v437_v57, %v433_v54 }
 0x19a   : > { %v452_v0 = vpack.c.bf16 %v439_v60, %v435_v59 }
 0x19b   : > { %v450_v3 = vpack.c.bf16 %v449_v62, %v448_v61  ;;  %454 = vrot.lane.b32.xlu0 %v451_v63, %s849_s9 }
 0x20d   : > { %v455_v4 = vpop.permute.xlu0 %454 }
 0x20e   : > { %v460_v5 = vsel %vm284_vm0, %v455_v4, 0 }
 0x20f   : > { %775 = vmatpush3.bf16.xpose.msra.mxu1 %v460_v5 }
 0x210   : > { %780 = vmatprep.subr.bf16.mxu1 %v847_v49 }
 0x216   : > { %777 = vmatmul.mubr.msk.bf16.vlgmr.msra.gmra.mrb[0].mxu1 %vm284_vm0, %v450_v3 }
 0x217   : > { %781 = vmatpush3.bf16.msra.mxu1 %v452_v0  ;;  %782 = vmatprep.mubr.msk.bf16.mxu1 %vm848_vm1, %v847_v49 }
 0x2e9   : > { %v496_v8 = vpop.f32.mrb[0].mxu1 }
 0x2ea   : > { %v503_v9 = vsel %vm446_vm2, %v496_v8, -1e+30  ;;  %v778_v10 = vpop.f32.mrb[1].mxu1 }
 0x2eb   : > { %v499_v11 = vpop.f32.mrb[2].mxu1  ;;  %v506_v12 = vsel %vm505_vm3, %v503_v9, -inf }
 0x2ec   : > { %v504_v13 = vsel %vm447_vm4, %v499_v11, -1e+30  ;;  %507 = vmax.xlane.f32.xlu1 %v506_v12  ;;  %v779_v14 = vpop.f32.mrb[3].mxu1 }
 0x2ed   : > { %v509_v15 = vsel %vm505_vm3, %v504_v13, -inf }
 0x2f0   : > { %510 = vmax.xlane.f32.xlu1 %v509_v15 }
 0x379   : > { %v508_v16 = vpop.xlane.xlu1 %507 }
 0x37a   : > { %v512_v17 = vsub.f32 %v503_v9, %v508_v16 }
 0x37c   : > { %v514_v18 = vmul.f32 1.442695, %v512_v17 }
 0x37d   : > { %v511_v19 = vpop.xlane.xlu1 %510 }
 0x37e   : > { %830 = vpow2.f32 %v514_v18  ;;  %v513_v20 = vsub.f32 %v504_v13, %v511_v19 }
 0x380   : > { %v516_v21 = vmul.f32 1.442695, %v513_v20 }
 0x382   : > { %832 = vpow2.f32 %v516_v21 }
 0x388   : > { %v831_v22 = vpop.eup %830 }
 0x389   : > { %v518_v23 = vsel %vm505_vm3, %v831_v22, 0.0 }
 0x38a   : > { %519 = vadd.xlane.f32.xlu1 %v518_v23 }
 0x38c   : > { %v833_v24 = vpop.eup %832 }
 0x38d   : > { %v521_v25 = vsel %vm505_vm3, %v833_v24, 0.0 }
 0x38e   : > { %522 = vadd.xlane.f32.xlu1 %v521_v25 }
 0x417   : > { %v520_v29 = vpop.xlane.xlu1 %519 }
 0x418   : > { %834 = vrcp.f32 %v520_v29 }
 0x41b   : > { %v523_v30 = vpop.xlane.xlu1 %522 }
 0x41c   : > { %836 = vrcp.f32 %v523_v30 }
 0x422   : > { %v835_v31 = vpop.eup %834 }
 0x423   : > { %v526_v33 = vmul.f32 %v835_v31, %v831_v22 }
 0x426   : > { %v837_v32 = vpop.eup %836 }
 0x427   : > { %v527_v34 = vmul.f32 %v837_v32, %v833_v24 }
 0x429   : > { %v528_v35 = vpack.c.bf16 %v527_v34, %v526_v33 }
 0x42b   : > { %783 = vmatmul.mubr.msk.bf16.vlgmr.msra.gmra.mrb[4].mxu1 %vm505_vm3, %v528_v35 }
 0x4fe   : > { %v566_v37 = vpop.f32.mrb[4].mxu1 }
 0x4ff   : > { %v784_v38 = vpop.f32.mrb[5].mxu1 }
 0x500   : > { %v569_v39 = vpop.f32.mrb[6].mxu1 }
 0x501   : > { %v573_v40 = vpack.c.bf16 %v569_v39, %v566_v37  ;;  %v785_v41 = vpop.f32.mrb[7].mxu1 }
 0x503   : > { %795 = vmatmul.mubr.msk.bf16.vlgmr.msra.gmra.mrb[4].mxu0 %vm284_vm0, %v573_v40 }
 0x5d6   : > { %v650_v43 = vpop.f32.mrb[4].mxu0 }
 0x5d7   : > { %v651_v44 = vadd.f32 %v747_v42, %v650_v43  ;;  %v796_v45 = vpop.f32.mrb[5].mxu0 }
 0x5d8   : > { %v653_v46 = vpop.f32.mrb[6].mxu0 }
 0x5d9   : > { %v657_v47 = vadd.f32 %v906_v1, %v651_v44  ;;  %v654_v48 = vadd.f32 %v747_v42, %v653_v46  ;;  %v797_v49 = vpop.f32.mrb[7].mxu0 }
 0x5db   : > { %v759_v50 = vpack.c.bf16 %v657_v47, %v657_v47  ;;  %v658_v51 = vadd.f32 %v908_v2, %v654_v48 }
 0x5dd   : > { %668 = vst.msk [vmem:[%s278_s22] sm:$0xf] %vm667_vm5, %v759_v50  ;;  %v760_v52 = vpack.c.bf16 %v658_v51, %v658_v51 }
 0x5df   : > { %669 = vst.msk [vmem:[%s278_s22 + $0x4] sm:$0xf] %vm667_vm5, %v760_v52 }
 0x5e0 PF: > { %s17_s24 = sadd.s32 1, %s844_s24  }
 0x5e1   : > { %p14_p4 = scmp.ge.s32.totalorder %s17_s24, 4  }
 0x5e3   :  { %16 = sbr.rel (!%p14_p4) target bundleno = 1 (0x1), region = 78 }

</bundles_post_ra>
